<compile_context>
chip_gen: v5e
topology: v5e:2x2
jax: 0.10.0
libtpu: 0.0.40
codegen_flags: <defaults>
</compile_context>

<pallas_src>
import functools

import jax
import jax.numpy as jnp
from jax.experimental import pallas as pl
from jax.experimental.pallas import tpu as pltpu

DIM1, DIM2, DIM3 = 256, 64, 32
R_PAD = 128                      # rank-32 bottleneck padded to full lane width


def _round_up(x, m):
    return (x + m - 1) // m * m


def _cdiv(a, b):
    return (a + b - 1) // b


def _sublane_pack(dtype):
    # rows per packed sublane group: 8 for f32, 16 for bf16, 32 for int8/fp8.
    return max(8, 32 // jnp.dtype(dtype).itemsize)


def _vmem_ceiling_bytes():
    cap = None
    try:
        cap = getattr(pltpu.get_tpu_info(), "vmem_capacity_bytes", None)
    except Exception:  # pragma: no cover - info query unavailable
        cap = None
    if not cap:
        cap = 64 << 20                      # conservative: v7x per-TC VMEM
    cap = min(int(cap), 128 << 20)          # v5e/v6e physical max
    return int(cap * 0.85)                  # ~15% headroom for the compiler


def _encoder_sc_kernel(x_ref, we_ref, wd_ref, o_ref):
    # dropout p=0.0 -> identity; forward() never applies the activation, so the
    # six-matmul chain is exactly the rank-32 linear map (x @ W_enc) @ W_dec.
    cdt = we_ref.dtype
    x = x_ref[...].astype(cdt)
    h = jnp.dot(x, we_ref[...], preferred_element_type=jnp.float32)
    o = jnp.dot(h.astype(cdt), wd_ref[...], preferred_element_type=jnp.float32)
    o_ref[...] = o.astype(o_ref.dtype)


@functools.partial(jax.jit, static_argnames=("tm", "compute_dtype", "out_dtype"))
def encoder_sc_forward(x, w1e, w2e, w3e, w1d, w2d, w3d, *, tm=1024,
                       compute_dtype=jnp.bfloat16, out_dtype=None):
    """Encoder_sc.forward(x) = x @ W1e @ W2e @ W3e @ W1d @ W2d @ W3d.

    Folding is valid only because forward() uses dropout p=0.0 and never
    applies the activation (inference-mode semantics of the reference module).
    """
    n, d_in = x.shape
    out_dtype = x.dtype if out_dtype is None else jnp.dtype(out_dtype)

    # ---- fold the six-weight chain into the low-rank pair (in f32) ---------
    w_enc = jnp.dot(jnp.dot(w1e.astype(jnp.float32), w2e.astype(jnp.float32),
                            preferred_element_type=jnp.float32),
                    w3e.astype(jnp.float32), preferred_element_type=jnp.float32)
    w_dec = jnp.dot(jnp.dot(w1d.astype(jnp.float32), w2d.astype(jnp.float32),
                            preferred_element_type=jnp.float32),
                    w3d.astype(jnp.float32), preferred_element_type=jnp.float32)
    rank = w_enc.shape[1]                                  # = 32
    w_enc_p = jnp.pad(w_enc, ((0, 0), (0, R_PAD - rank))).astype(compute_dtype)
    w_dec_p = jnp.pad(w_dec, ((0, R_PAD - rank), (0, 0))).astype(compute_dtype)

    # ---- row tiling: no padding / copies of x or the output ----------------
    pack = max(_sublane_pack(x.dtype), _sublane_pack(out_dtype))
    tm_eff = _round_up(min(tm, _round_up(n, pack)), pack)
    # v7x has 2 TensorCores: make sure the "parallel" row axis has >= 2 steps.
    if _cdiv(n, tm_eff) < 2 and n >= 2 * pack:
        tm_eff = _round_up(_cdiv(n, 2), pack)

    # ---- per-generation VMEM sizing: shrink the tile, never clamp the limit
    x_b = jnp.dtype(x.dtype).itemsize
    o_b = jnp.dtype(out_dtype).itemsize
    w_b = jnp.dtype(compute_dtype).itemsize
    ceiling = _vmem_ceiling_bytes()

    def vmem_needed(rows):
        return (2 * rows * d_in * x_b                 # x tile, double-buffered
                + 2 * rows * d_in * o_b               # out tile, double-buffered
                + 2 * 2 * d_in * R_PAD * w_b          # both (tiny) weights, 2x-buffered
                + (4 << 20))                          # compiler scratch headroom

    while vmem_needed(tm_eff) > ceiling and tm_eff > pack:
        tm_eff = max(pack, _round_up(tm_eff // 2, pack))

    grid = (_cdiv(n, tm_eff),)
    vmem_bytes = int(min(max(vmem_needed(tm_eff), 32 << 20), ceiling))

    cost = pl.CostEstimate(
        flops=4 * n * d_in * R_PAD,                   # two MXU GEMMs per row
        transcendentals=0,
        bytes_accessed=n * d_in * (x_b + o_b) + 2 * d_in * R_PAD * w_b)

    return pl.pallas_call(
        _encoder_sc_kernel,
        out_shape=jax.ShapeDtypeStruct((n, d_in), out_dtype),
        grid_spec=pltpu.PrefetchScalarGridSpec(
            num_scalar_prefetch=0,
            grid=grid,
            in_specs=[
                pl.BlockSpec((tm_eff, d_in), lambda i: (i, 0)),   # x row tile
                pl.BlockSpec((d_in, R_PAD), lambda i: (0, 0)),    # W_enc (resident)
                pl.BlockSpec((R_PAD, d_in), lambda i: (0, 0)),    # W_dec (resident)
            ],
            out_specs=pl.BlockSpec((tm_eff, d_in), lambda i: (i, 0)),
        ),
        compiler_params=pltpu.CompilerParams(
            dimension_semantics=("parallel",),        # rows shard across TCs (v7x)
            vmem_limit_bytes=vmem_bytes),
        cost_estimate=cost,
    )(x, w_enc_p, w_dec_p)


def xavier_uniform(key, fan_in, fan_out, dtype=jnp.float32):
    # Matches torch.nn.init.xavier_uniform_ (gain=1).
    bound = (6.0 / (fan_in + fan_out)) ** 0.5
    return jax.random.uniform(key, (fan_in, fan_out), dtype,
                              minval=-bound, maxval=bound)


def make_params(key, dim_input):
    ks = jax.random.split(key, 6)
    return dict(
        w1e=xavier_uniform(ks[0], dim_input, DIM1),
        w2e=xavier_uniform(ks[1], DIM1, DIM2),
        w3e=xavier_uniform(ks[2], DIM2, DIM3),
        w1d=xavier_uniform(ks[3], DIM3, DIM2),
        w2d=xavier_uniform(ks[4], DIM2, DIM1),
        w3d=xavier_uniform(ks[5], DIM1, dim_input),
    )


def reference_forward(x, p):
    h = x
    for w in (p["w1e"], p["w2e"], p["w3e"], p["w1d"], p["w2d"], p["w3d"]):
        h = h @ w
    return h


if __name__ == "__main__":
    key = jax.random.PRNGKey(0)
    k_x, k_p = jax.random.split(key)

    # Small shapes; N deliberately NOT a multiple of the row tile or of 128,
    # and d_in deliberately below 128 (handled via the full-dim block exemption).
    N, DIM_INPUT = 200, 64
    x = jax.random.normal(k_x, (N, DIM_INPUT), dtype=jnp.float32)
    params = make_params(k_p, DIM_INPUT)
    ws = (params["w1e"], params["w2e"], params["w3e"],
          params["w1d"], params["w2d"], params["w3d"])

    ref = reference_forward(x, params)

    # Exact f32 path: matches the PyTorch module numerics closely.
    out_f32 = jax.block_until_ready(
        encoder_sc_forward(x, *ws, compute_dtype=jnp.float32))
    assert out_f32.shape == (N, DIM_INPUT)
    assert out_f32.dtype == x.dtype
    assert jnp.allclose(out_f32, ref, atol=2e-3, rtol=2e-3)

    # Default bf16-operand path (f32 accumulate, f32 output) — looser tolerance.
    out_def = jax.block_until_ready(encoder_sc_forward(x, *ws))
    assert out_def.shape == (N, DIM_INPUT)
    assert out_def.dtype == x.dtype
    assert jnp.allclose(out_def, ref, atol=5e-2, rtol=5e-2)

    print("KERNEL_OK")
</pallas_src>

<mosaic_0001>
module attributes {stable_mosaic.version = 11 : i64} {
  func.func @_encoder_sc_kernel(%arg0: i32, %arg1: memref<104x64xf32, #tpu.memory_space<vmem>>, %arg2: memref<64x128xf32, #tpu.memory_space<vmem>>, %arg3: memref<128x64xf32, #tpu.memory_space<vmem>>, %arg4: memref<104x64xf32, #tpu.memory_space<vmem>>) attributes {dimension_semantics = [#tpu.dimension_semantics<parallel>], iteration_bounds = array<i64: 2>, scalar_prefetch = 0 : i64, scratch_operands = 0 : i64, tpu.core_type = #tpu.core_type<tc>, window_params = [{transform_indices = @transform_0, window_bounds = array<i64: 104, 64>}, {pipeline_mode = #tpu.pipeline_mode<synchronous>, transform_indices = @transform_1, window_bounds = array<i64: 64, 128>}, {pipeline_mode = #tpu.pipeline_mode<synchronous>, transform_indices = @transform_2, window_bounds = array<i64: 128, 64>}, {transform_indices = @transform_3, window_bounds = array<i64: 104, 64>}]} {
    %c0 = arith.constant 0 : index
    %c0_0 = arith.constant 0 : index
    %0 = vector.load %arg1[%c0, %c0_0] : memref<104x64xf32, #tpu.memory_space<vmem>>, vector<104x64xf32>
    %c0_1 = arith.constant 0 : index
    %c0_2 = arith.constant 0 : index
    %1 = vector.load %arg2[%c0_1, %c0_2] : memref<64x128xf32, #tpu.memory_space<vmem>>, vector<64x128xf32>
    %cst = arith.constant dense<0.000000e+00> : vector<104x128xf32>
    %2 = tpu.matmul %0, %1, %cst {dimension_numbers = #tpu.dot_dimension_numbers<[1], [0], [0], [1], [0, 0, 1, 1], [], []>} : vector<104x64xf32>, vector<64x128xf32>, vector<104x128xf32> -> vector<104x128xf32>
    %c0_3 = arith.constant 0 : index
    %c0_4 = arith.constant 0 : index
    %3 = vector.load %arg3[%c0_3, %c0_4] : memref<128x64xf32, #tpu.memory_space<vmem>>, vector<128x64xf32>
    %cst_5 = arith.constant dense<0.000000e+00> : vector<104x64xf32>
    %4 = tpu.matmul %2, %3, %cst_5 {dimension_numbers = #tpu.dot_dimension_numbers<[1], [0], [0], [1], [0, 0, 1, 1], [], []>} : vector<104x128xf32>, vector<128x64xf32>, vector<104x64xf32> -> vector<104x64xf32>
    %c0_6 = arith.constant 0 : index
    %c0_7 = arith.constant 0 : index
    %5 = vector.load %arg4[%c0_6, %c0_7] : memref<104x64xf32, #tpu.memory_space<vmem>>, vector<104x64xf32>
    tpu.vector_store %arg4[%c0_6, %c0_7], %4 {strides = array<i32>} : memref<104x64xf32, #tpu.memory_space<vmem>>, vector<104x64xf32>,
    return
  }
  func.func @transform_0(%arg0: i32) -> (i32, i32) {
    %c0_i32 = arith.constant 0 : i32
    %c0_i32_0 = arith.constant 0 : i32
    return %arg0, %c0_i32 : i32, i32
  }
  func.func @transform_1(%arg0: i32) -> (i32, i32) {
    %c0_i32 = arith.constant 0 : i32
    %c0_i32_0 = arith.constant 0 : i32
    %c0_i32_1 = arith.constant 0 : i32
    return %c0_i32, %c0_i32_0 : i32, i32
  }
  func.func @transform_2(%arg0: i32) -> (i32, i32) {
    %c0_i32 = arith.constant 0 : i32
    %c0_i32_0 = arith.constant 0 : i32
    %c0_i32_1 = arith.constant 0 : i32
    return %c0_i32, %c0_i32_0 : i32, i32
  }
  func.func @transform_3(%arg0: i32) -> (i32, i32) {
    %c0_i32 = arith.constant 0 : i32
    %c0_i32_0 = arith.constant 0 : i32
    return %arg0, %c0_i32 : i32, i32
  }
}

</mosaic_0001>

<bundles_post_ra>
// kernel: encoder_sc_forward.1
= control target key start
LH: loop header
LB: loop body
LE: loop exit
PB: predicated region body
PF: predicated region fallthrough
CT: control target
= control target key end

     0   :  { %s935_s12 = smov 0   ;;  %s937_s13 = smov 0   ;;  %s1194_s0 = inlined_call_operand.vmem [shape: f32[200,64], index: 0, kind: input, shape index: {}]   ;;  %s1195_s1 = inlined_call_operand.vmem [shape: f32[64,128], index: 1, kind: input, shape index: {}]   ;;  %s1196_s2 = inlined_call_operand.vmem [shape: f32[128,64], index: 2, kind: input, shape index: {}]   ;;  %s1197_s3 = inlined_call_operand.vmem [shape: f32[200,64], index: 3, kind: output, shape index: {}]  }
   0x1   :  { %s939_s14 = smov 0  }
   0x2 LB: > { %s948_s15 = sadd.s32 4294967295, %s881_s14   ;;  %s950_s16 = sadd.s32 1, %s881_s14   ;;  %s881_s14 = sphi %s939_s14, %s1206_s14   ;;  %s877_s13 = sphi %s937_s13, %s1205_s13   ;;  %s873_s12 = sphi %s935_s12, %s1204_s12  }
   0x3   : > { %s85_s17 = ssub.s32 %s881_s14, %s950_s16  ;;  %s88_s18 = sadd.s32 1, %s877_s13 }
   0x4   : > { %p86_p0 = scmp.eq.s32.totalorder %s85_s17, 0  ;;  %p98_p1 = scmp.ne.s32.totalorder %s877_s13, %s873_s12 }
   0x5   : > { %p99_p2 = scmp.eq.s32.totalorder %s948_s15, 1  ;;  %p663_p3 = scmp.ge.s32.totalorder %s881_s14, 1 }
   0x6   : > { %s958_s19 = scalar_select %p86_p0, %s877_s13, %s88_s18  }
   0x7   : > { %p960_p4 = por %p99_p2, %p98_p1  ;;  %p146_p5 = scmp.lt.s32.totalorder %s881_s14, 3 }
   0x9   : > { %p147_p6 = pnand %p663_p3, %p146_p5 }
   0xa   : > { %s971_s25 = smul.u32 (!%p147_p6), 13, %s948_s15 }
   0xb   : > { %150 = sbr.rel (%p147_p6) target bundleno = 431 (0x1af), region = 32 }
   0xc   : > { %p178_p7 = scmp.lt.s32.totalorder (!%p147_p6), %s971_s25, 24 }
  0x10   : > { %v212_v0 = vld [vmem:[%s1195_s1 + $0x38] sm:$0xff]  ;;  %v211_v1 = vld [vmem:[%s1195_s1 + $0x30] sm:$0xff]  ;;  %v210_v2 = vld [vmem:[%s1195_s1 + $0x28] sm:$0xff]  ;;  %s179_s30 = scalar_select %p178_p7, %s971_s25, 24  ;;  %vm213_vm0 = vcmask 523264  }
  0x11   : > { %261 = vmatpush.msra.mxu0 %v212_v0  ;;  %691 = vmatpush.msra.mxu3 %v212_v0  ;;  %v209_v3 = vld [vmem:[%s1195_s1 + $0x20] sm:$0xff]  ;;  %v208_v4 = vld [vmem:[%s1195_s1 + $0x18] sm:$0xff]  ;;  %v207_v5 = vld [vmem:[%s1195_s1 + $0x10] sm:$0xff]  ;;  %s690_s11 = smul.u32 (%p960_p4), 104, %s948_s15 }
  0x12   : > { %s664_s6 = sshll.u32 %s179_s30, 3  ;;  %v206_v6 = vld [vmem:[%s1195_s1 + $0x8] sm:$0xff]  ;;  %v205_v7 = vld [vmem:[%s1195_s1] sm:$0xff]  ;;  %v324_v15 = vld [vmem:[%s1196_s2 + $0x78] sm:$0xff] }
  0x13   : > { %262 = vmatpush.msra.mxu0 %v211_v1  ;;  %692 = vmatpush.msra.mxu3 %v211_v1  ;;  %s993_s17 = scalar_lea.vmem %s1194_s0, %s664_s6  ;;  %v323_v16 = vld [vmem:[%s1196_s2 + $0x70] sm:$0xff]  ;;  %v322_v17 = vld [vmem:[%s1196_s2 + $0x68] sm:$0xff]  ;;  %v321_v19 = vld [vmem:[%s1196_s2 + $0x60] sm:$0xff]  ;;  %s1108_s21 = scalar_lea.vmem (%p960_p4), %s1197_s3, %s690_s11  }
  0x14   : > { %v192_v8 = vld [vmem:[%s993_s17] sm:$0xff]  ;;  %v193_v9 = vld [vmem:[%s993_s17 + $0x8] sm:$0xff]  ;;  %v194_v11 = vld [vmem:[%s993_s17 + $0x10] sm:$0xff]  ;;  %325 = vmatpush.msra.mxu1 %v324_v15  ;;  %699 = vmatpush.msra.mxu2 %v324_v15 }
  0x15   : > { %263 = vmatpush.msra.mxu0 %v210_v2  ;;  %693 = vmatpush.msra.mxu3 %v210_v2  ;;  %v200_v10 = vld [vmem:[%s993_s17 + $0x40] sm:$0xff]  ;;  %v201_v12 = vld [vmem:[%s993_s17 + $0x48] sm:$0xff]  ;;  %v195_v13 = vld [vmem:[%s993_s17 + $0x18] sm:$0xff] }
  0x16   : > { %v202_v14 = vld [vmem:[%s993_s17 + $0x50] sm:$0xff]  ;;  %326 = vmatpush.msra.mxu1 %v323_v16  ;;  %701 = vmatpush.msra.mxu2 %v323_v16  ;;  %v196_v18 = vld [vmem:[%s993_s17 + $0x20] sm:$0xff]  ;;  %v203_v20 = vld [vmem:[%s993_s17 + $0x58] sm:$0xff] }
  0x17   : > { %264 = vmatpush.msra.mxu0 %v209_v3  ;;  %694 = vmatpush.msra.mxu3 %v209_v3  ;;  %v320_v21 = vld [vmem:[%s1196_s2 + $0x58] sm:$0xff]  ;;  %v319_v22 = vld [vmem:[%s1196_s2 + $0x50] sm:$0xff]  ;;  %v318_v23 = vld [vmem:[%s1196_s2 + $0x48] sm:$0xff] }
  0x18   : > { %327 = vmatpush.msra.mxu1 %v322_v17  ;;  %703 = vmatpush.msra.mxu2 %v322_v17  ;;  %v197_v24 = vld [vmem:[%s993_s17 + $0x28] sm:$0xff]  ;;  %v317_v25 = vld [vmem:[%s1196_s2 + $0x40] sm:$0xff]  ;;  %v316_v27 = vld [vmem:[%s1196_s2 + $0x38] sm:$0xff] }
  0x19   : > { %265 = vmatpush.msra.mxu0 %v208_v4  ;;  %695 = vmatpush.msra.mxu3 %v208_v4  ;;  %v204_v26 = vld [vmem:[%s993_s17 + $0x60] sm:$0xff]  ;;  %v315_v28 = vld [vmem:[%s1196_s2 + $0x30] sm:$0xff]  ;;  %v314_v29 = vld [vmem:[%s1196_s2 + $0x28] sm:$0xff] }
  0x1a   : > { %328 = vmatpush.msra.mxu1 %v321_v19  ;;  %705 = vmatpush.msra.mxu2 %v321_v19  ;;  %v198_v30 = vld [vmem:[%s993_s17 + $0x30] sm:$0xff]  ;;  %v313_v31 = vld [vmem:[%s1196_s2 + $0x20] sm:$0xff]  ;;  %v312_v32 = vld [vmem:[%s1196_s2 + $0x18] sm:$0xff] }
  0x1b   : > { %266 = vmatpush.msra.mxu0 %v207_v5  ;;  %696 = vmatpush.msra.mxu3 %v207_v5  ;;  %v311_v33 = vld [vmem:[%s1196_s2 + $0x10] sm:$0xff]  ;;  %v310_v34 = vld [vmem:[%s1196_s2 + $0x8] sm:$0xff]  ;;  %v199_v35 = vld [vmem:[%s993_s17 + $0x38] sm:$0xff]  ;;  %s170_s17 = sand.u32 1, %s873_s12   ;;  %s402_s12 = ssub.s32 (%p960_p4), 25, %s971_s25 }
  0x1c   : > { %329 = vmatpush.msra.mxu1 %v320_v21  ;;  %707 = vmatpush.msra.mxu2 %v320_v21  ;;  %v309_v36 = vld [vmem:[%s1196_s2] sm:$0xff]  ;;  %s731_s9 = smul.u32 104, %s170_s17  ;;  %p403_p8 = scmp.lt.s32.totalorder (%p960_p4), %s402_s12, 13 }
  0x1d   : > { %267 = vmatpush.msra.mxu0 %v206_v6  ;;  %697 = vmatpush.msra.mxu3 %v206_v6 }
  0x1e   : > { %330 = vmatpush.msra.mxu1 %v319_v22  ;;  %709 = vmatpush.msra.mxu2 %v319_v22  ;;  %s1073_s10 = scalar_lea.vmem [#allocation2], %s731_s9  }
  0x1f   : > { %268 = vmatpush.msra.mxu0 %v205_v7  ;;  %698 = vmatpush.msra.mxu3 %v205_v7 }
  0x20   : > { %665 = vmatmul.msk.f32.vlgmr.msra.gmra.mxu0 %vm213_vm0, %v192_v8  ;;  %673 = vmatmul.msk.f32.vlgmr.msra.gmra.mxu3 %vm213_vm0, %v200_v10 }
  0x21   : > { %700 = vmatpush.msrb.mxu3 %v324_v15  ;;  %331 = vmatpush.msra.mxu1 %v318_v23 }
  0x22   : > { %711 = vmatpush.msra.mxu2 %v318_v23 }
  0x23   : > { %702 = vmatpush.msrb.mxu3 %v323_v16  ;;  %332 = vmatpush.msra.mxu1 %v317_v25 }
  0x24   : > { %713 = vmatpush.msra.mxu2 %v317_v25 }
  0x25   : > { %704 = vmatpush.msrb.mxu3 %v322_v17  ;;  %333 = vmatpush.msra.mxu1 %v316_v27 }
  0x26   : > { %715 = vmatpush.msra.mxu2 %v316_v27 }
  0x27   : > { %706 = vmatpush.msrb.mxu3 %v321_v19  ;;  %334 = vmatpush.msra.mxu1 %v315_v28 }
  0x28   : > { %666 = vmatmul.msk.f32.gmra.mxu0 %vm213_vm0, %v193_v9  ;;  %674 = vmatmul.msk.f32.gmra.mxu3 %vm213_vm0, %v201_v12 }
  0x29   : > { %708 = vmatpush.msrb.mxu3 %v320_v21  ;;  %717 = vmatpush.msra.mxu2 %v315_v28 }
  0x2a   : > { %335 = vmatpush.msra.mxu1 %v314_v29 }
  0x2b   : > { %710 = vmatpush.msrb.mxu3 %v319_v22  ;;  %719 = vmatpush.msra.mxu2 %v314_v29 }
  0x2c   : > { %336 = vmatpush.msra.mxu1 %v313_v31 }
  0x2d   : > { %712 = vmatpush.msrb.mxu3 %v318_v23  ;;  %721 = vmatpush.msra.mxu2 %v313_v31 }
  0x2e   : > { %337 = vmatpush.msra.mxu1 %v312_v32 }
  0x2f   : > { %714 = vmatpush.msrb.mxu3 %v317_v25  ;;  %723 = vmatpush.msra.mxu2 %v312_v32 }
  0x30   : > { %667 = vmatmul.msk.f32.gmra.mxu0 %vm213_vm0, %v194_v11  ;;  %675 = vmatmul.msk.f32.gmra.mxu3 %vm213_vm0, %v202_v14 }
  0x31   : > { %716 = vmatpush.msrb.mxu3 %v316_v27  ;;  %338 = vmatpush.msra.mxu1 %v311_v33 }
  0x32   : > { %725 = vmatpush.msra.mxu2 %v311_v33 }
  0x33   : > { %718 = vmatpush.msrb.mxu3 %v315_v28  ;;  %339 = vmatpush.msra.mxu1 %v310_v34 }
  0x34   : > { %727 = vmatpush.msra.mxu2 %v310_v34 }
  0x35   : > { %720 = vmatpush.msrb.mxu3 %v314_v29  ;;  %340 = vmatpush.msra.mxu1 %v309_v36 }
  0x36   : > { %729 = vmatpush.msra.mxu2 %v309_v36 }
  0x37   : > { %722 = vmatpush.msrb.mxu3 %v313_v31 }
  0x38   : > { %668 = vmatmul.msk.f32.gmra.mxu0 %vm213_vm0, %v195_v13  ;;  %676 = vmatmul.msk.f32.gmra.mxu3 %vm213_vm0, %v203_v20 }
  0x39   : > { %724 = vmatpush.msrb.mxu3 %v312_v32 }
  0x3b   : > { %726 = vmatpush.msrb.mxu3 %v311_v33 }
  0x3d   : > { %728 = vmatpush.msrb.mxu3 %v310_v34 }
  0x3f   : > { %730 = vmatpush.msrb.mxu3 %v309_v36 }
  0x40   : > { %669 = vmatmul.msk.f32.gmra.mxu0 %vm213_vm0, %v196_v18  ;;  %677 = vmatmul.msk.f32.gmra.mxu3 %vm213_vm0, %v204_v26 }
  0x48   : > { %670 = vmatmul.msk.f32.gmra.mxu0 %vm213_vm0, %v197_v24 }
  0x50   : > { %671 = vmatmul.msk.f32.gmra.mxu0 %vm213_vm0, %v198_v30 }
  0x58   : > { %672 = vmatmul.msk.f32.gmra.mxu0 %vm213_vm0, %v199_v35 }
  0x9d   : > { %v270_v37 = vpop.f32.mrf.mxu0 }
  0x9e   : > { %341 = vmatmul.f32.vlgmr.msra.gmra.mxu1 %v270_v37 }
  0xa3   : > { %v294_v40 = vpop.f32.mrf.mxu3 }
  0xa5   : > { %v273_v38 = vpop.f32.mrf.mxu0 }
  0xa6   : > { %344 = vmatmul.f32.gmra.mxu1 %v273_v38 }
  0xab   : > { %v297_v42 = vpop.f32.mrf.mxu3 }
  0xad   : > { %v276_v39 = vpop.f32.mrf.mxu0 }
  0xae   : > { %347 = vmatmul.f32.gmra.mxu1 %v276_v39 }
  0xb3   : > { %v300_v44 = vpop.f32.mrf.mxu3 }
  0xb5   : > { %v279_v41 = vpop.f32.mrf.mxu0 }
  0xb6   : > { %350 = vmatmul.f32.gmra.mxu1 %v279_v41 }
  0xbb   : > { %v303_v46 = vpop.f32.mrf.mxu3 }
  0xbc   : > { %374 = vmatmul.f32.vlgmr.msrb.gmra.mxu3 %v303_v46 }
  0xbd   : > { %v282_v43 = vpop.f32.mrf.mxu0 }
  0xbe   : > { %353 = vmatmul.f32.gmra.mxu1 %v282_v43 }
  0xc3   : > { %v306_v48 = vpop.f32.mrf.mxu3 }
  0xc4   : > { %377 = vmatmul.f32.gmra.mxu3 %v306_v48 }
  0xc5   : > { %v285_v45 = vpop.f32.mrf.mxu0 }
  0xc6   : > { %356 = vmatmul.f32.vlgmr.msra.gmra.mxu2 %v285_v45 }
  0xcd   : > { %v288_v47 = vpop.f32.mrf.mxu0 }
  0xce   : > { %359 = vmatmul.f32.gmra.mxu2 %v288_v47 }
  0xd5   : > { %v291_v49 = vpop.f32.mrf.mxu0 }
  0xd6   : > { %362 = vmatmul.f32.gmra.mxu2 %v291_v49 }
  0xde   : > { %365 = vmatmul.f32.gmra.mxu2 %v294_v40 }
  0xe6   : > { %368 = vmatmul.f32.gmra.mxu2 %v297_v42 }
  0xee   : > { %371 = vmatmul.f32.gmra.mxu2 %v300_v44 }
 0x11b   : > { %v342_v50 = vpop.f32.mrf.mxu1 }
 0x11c   : > { %381 = vst.msk [vmem:[%s1073_s10] sm:$0xff] %vm213_vm0, %v342_v50 }
 0x123   : > { %v345_v51 = vpop.f32.mrf.mxu1 }
 0x124   : > { %382 = vst.msk [vmem:[%s1073_s10 + $0x8] sm:$0xff] %vm213_vm0, %v345_v51 }
 0x12b   : > { %v348_v52 = vpop.f32.mrf.mxu1 }
 0x12c   : > { %383 = vst.msk [vmem:[%s1073_s10 + $0x10] sm:$0xff] %vm213_vm0, %v348_v52 }
 0x133   : > { %v351_v53 = vpop.f32.mrf.mxu1 }
 0x134   : > { %384 = vst.msk [vmem:[%s1073_s10 + $0x18] sm:$0xff] %vm213_vm0, %v351_v53 }
 0x13b   : > { %v354_v54 = vpop.f32.mrf.mxu1 }
 0x13c   : > { %385 = vst.msk [vmem:[%s1073_s10 + $0x20] sm:$0xff] %vm213_vm0, %v354_v54 }
 0x13f   : > { %v375_v56 = vpop.f32.mrf.mxu3 }
 0x140   : > { %392 = vst.msk [vmem:[%s1073_s10 + $0x58] sm:$0xff] %vm213_vm0, %v375_v56 }
 0x147   : > { %v378_v58 = vpop.f32.mrf.mxu3 }
 0x148   : > { %393 = vst.msk [vmem:[%s1073_s10 + $0x60] sm:$0xff] %vm213_vm0, %v378_v58 }
 0x149   : > { %v357_v55 = vpop.f32.mrf.mxu2 }
 0x14a   : > { %386 = vst.msk [vmem:[%s1073_s10 + $0x28] sm:$0xff] %vm213_vm0, %v357_v55 }
 0x151   : > { %v360_v57 = vpop.f32.mrf.mxu2 }
 0x152   : > { %387 = vst.msk [vmem:[%s1073_s10 + $0x30] sm:$0xff] %vm213_vm0, %v360_v57 }
 0x159   : > { %v363_v59 = vpop.f32.mrf.mxu2 }
 0x15a   : > { %388 = vst.msk [vmem:[%s1073_s10 + $0x38] sm:$0xff] %vm213_vm0, %v363_v59 }
 0x161   : > { %v366_v60 = vpop.f32.mrf.mxu2 }
 0x162   : > { %389 = vst.msk [vmem:[%s1073_s10 + $0x40] sm:$0xff] %vm213_vm0, %v366_v60 }
 0x169   : > { %v369_v61 = vpop.f32.mrf.mxu2 }
 0x16a   : > { %390 = vst.msk [vmem:[%s1073_s10 + $0x48] sm:$0xff] %vm213_vm0, %v369_v61 }
 0x16e   : > { %400 = sbr.rel (!%p960_p4) target bundleno = 431 (0x1af), region = 36 }
 0x171   : > { %v372_v62 = vpop.f32.mrf.mxu2 }
 0x172   : > { %391 = vst.msk [vmem:[%s1073_s10 + $0x50] sm:$0xff] %vm213_vm0, %v372_v62 }
 0x173   : > { %s1208_s12 = smov (!%p403_p8, %s402_s12), 13 }
 0x174   : > { %s678_s22 = sshll.u32 %s1208_s12, 3 }
 0x175   : > { %p681_p9 = scmp.eq.s32.totalorder %s678_s22, 0 }
 0x176   : > { %821 = sdivrem.u32 (!%p681_p9), %s1208_s12, 13 }
 0x177   : > { %411 = sbr.rel (%p681_p9) target bundleno = 431 (0x1af), region = 40 }
 0x17f   : > { %s1114_s20 = spop.drf %821 }
 0x180   : > { %s823_s23 = spop.drf %821  ;;  %p682_p10 = scmp.le.s32.totalorder %s1114_s20, 0 }
 0x181   : > { %s1199_s15 = smov (!%p682_p10), %s1108_s21  ;;  %s1200_s25 = smov (!%p682_p10), %s1073_s10 }
 0x182   : > { %616 = sbr.rel (%p682_p10) target bundleno = 405 (0x195), region = 116  ;;  %s1123_s24 = smov (!%p682_p10), 0  }
 0x183   : > { %s1125_s26 = smov (!%p682_p10), 0  }
 0x187 LB: >> { %v500_v63 = vld [vmem:[%s889_s25] sm:$0xff]  ;;  %v502_v0 = vld [vmem:[%s889_s25 + $0x8] sm:$0xff]  ;;  %v504_v1 = vld [vmem:[%s889_s25 + $0x10] sm:$0xff]  ;;  %s526_s27 = sadd.s32 1, %s893_s24  ;;  %s494_s26 = sadd.s32 1, %s897_s26   ;;  %s897_s26 = sphi %s1125_s26, %s494_s26   ;;  %s893_s24 = sphi %s1123_s24, %s1203_s24   ;;  %s889_s25 = sphi %s1200_s25, %s1202_s25   ;;  %s885_s15 = sphi %s1199_s15, %s1201_s15  }
 0x188   : >> { %501 = vst [vmem:[%s885_s15] sm:$0xff] %v500_v63  ;;  %v506_v2 = vld [vmem:[%s889_s25 + $0x18] sm:$0xff]  ;;  %p527_p11 = scmp.ge.s32.totalorder %s526_s27, %s1114_s20  ;;  %v508_v3 = vld [vmem:[%s889_s25 + $0x20] sm:$0xff]  ;;  %v510_v4 = vld [vmem:[%s889_s25 + $0x28] sm:$0xff]  ;;  %p493_p12 = scmp.ge.s32.totalorder %s494_s26, %s1114_s20 }
 0x189   : >> { %503 = vst [vmem:[%s885_s15 + $0x8] sm:$0xff] %v502_v0  ;;  %v512_v5 = vld [vmem:[%s889_s25 + $0x30] sm:$0xff]  ;;  %v514_v6 = vld [vmem:[%s889_s25 + $0x38] sm:$0xff]  ;;  %v516_v7 = vld [vmem:[%s889_s25 + $0x40] sm:$0xff] }
 0x18a   : >> { %505 = vst [vmem:[%s885_s15 + $0x10] sm:$0xff] %v504_v1  ;;  %s1210_s27 = smov (%p527_p11, %s526_s27), 0  ;;  %v518_v8 = vld [vmem:[%s889_s25 + $0x48] sm:$0xff]  ;;  %v520_v9 = vld [vmem:[%s889_s25 + $0x50] sm:$0xff]  ;;  %v522_v10 = vld [vmem:[%s889_s25 + $0x58] sm:$0xff] }
 0x18b   : >> { %507 = vst [vmem:[%s885_s15 + $0x18] sm:$0xff] %v506_v2  ;;  %s529_s28 = smul.u32 104, %s1210_s27  ;;  %v524_v11 = vld [vmem:[%s889_s25 + $0x60] sm:$0xff]  ;;  %s1203_s24 = smov %s1210_s27 }
 0x18c   : >> { %509 = vst [vmem:[%s885_s15 + $0x20] sm:$0xff] %v508_v3 }
 0x18d   : >> { %511 = vst [vmem:[%s885_s15 + $0x28] sm:$0xff] %v510_v4  ;;  %s531_s29 = scalar_lea.vmem %s1073_s10, %s529_s28 [#allocation2]   ;;  %s532_s30 = scalar_lea.vmem %s1108_s21, %s529_s28  }
 0x18e   : >> { %513 = vst [vmem:[%s885_s15 + $0x30] sm:$0xff] %v512_v5  ;;  %s1202_s25 = smov %s531_s29 }
 0x18f   : >> { %515 = vst [vmem:[%s885_s15 + $0x38] sm:$0xff] %v514_v6 }
 0x190   : >> { %517 = vst [vmem:[%s885_s15 + $0x40] sm:$0xff] %v516_v7  ;;  %496 = sbr.rel (!%p493_p12) target bundleno = 391 (0x187), region = 122 }
 0x191   : >> { %519 = vst [vmem:[%s885_s15 + $0x48] sm:$0xff] %v518_v8 }
 0x192   : >> { %521 = vst [vmem:[%s885_s15 + $0x50] sm:$0xff] %v520_v9 }
 0x193   : >> { %523 = vst [vmem:[%s885_s15 + $0x58] sm:$0xff] %v522_v10 }
 0x194   : >> { %525 = vst [vmem:[%s885_s15 + $0x60] sm:$0xff] %v524_v11  ;;  %s1201_s15 = smov %s532_s30 }
 0x195 PF: > { %824 = sdivrem.u32 %s1208_s12, 13 }
 0x196   : > { %s683_s4 = smul.u32 104, %s1114_s20 }
 0x198   : > { %s1179_s5 = scalar_lea.vmem %s1073_s10, %s683_s4 [#allocation2]   ;;  %s539_s6 = scalar_lea.vmem %s1108_s21, %s683_s4  }
 0x19e   : > { %s825_s7 = spop.drf %824 }
 0x19f   : > { %s826_s8 = spop.drf %824 }
 0x1a0   : > { %p685_p13 = scmp.le.s32.totalorder %s826_s8, 0 }
 0x1a1   : > { %s899_s17 = smov (!%p685_p13), %s539_s6   ;;  %s903_s9 = smov (!%p685_p13), %s1179_s5  }
 0x1a2   : > { %630 = sbr.rel (%p685_p13) target bundleno = 431 (0x1af), region = 127  ;;  %s907_s11 = smov (!%p685_p13), 0  }
 0x1a3   : > { %s911_s14 = smov (!%p685_p13), 0  }
 0x1a7 LB: >> { %v549_v12 = vld [vmem:[%s905_s9] sm:$0xff]  ;;  %s551_s10 = sadd.s32 1, %s909_s11  ;;  %s543_s14 = sadd.s32 1, %s913_s14   ;;  %s913_s14 = sphi %s911_s14, %s543_s14   ;;  %s909_s11 = sphi %s907_s11, %s908_s11   ;;  %s905_s9 = sphi %s903_s9, %s556_s9   ;;  %s901_s17 = sphi %s899_s17, %s557_s17  }
 0x1a8   : >> { %550 = vst [vmem:[%s901_s17] sm:$0xff] %v549_v12  ;;  %p552_p0 = scmp.ge.s32.totalorder %s551_s10, %s826_s8  ;;  %p542_p1 = scmp.ge.s32.totalorder %s543_s14, %s826_s8 }
 0x1aa   : >> { %s1212_s10 = smov (%p552_p0, %s551_s10), 0  ;;  %545 = sbr.rel (!%p542_p1) target bundleno = 423 (0x1a7), region = 133 }
 0x1ab   : >> { %s686_s12 = sshll.u32 %s1212_s10, 3  ;;  %s908_s11 = smov %s1212_s10  }
 0x1ac   : >> { %s556_s9 = scalar_lea.vmem %s1179_s5, %s686_s12 [#allocation2]   ;;  %s557_s17 = scalar_lea.vmem %s539_s6, %s686_s12  }
 0x1af PF: > { %p10_p2 = scmp.ge.s32.totalorder %s950_s16, 4   ;;  %s1204_s12 = smov %s877_s13 }
 0x1b0   : > { %s1205_s13 = smov %s958_s19  ;;  %s1206_s14 = smov %s950_s16 }
 0x1b1   :  { %12 = sbr.rel (!%p10_p2) target bundleno = 2 (0x2), region = 144 }

</bundles_post_ra>
